<compile_context>
chip_gen: v6e
topology: v6e:2x2x1
jax: 0.10.0
libtpu: 0.0.40
codegen_flags: <defaults>
</compile_context>

<pallas_src>
import functools

import jax
import jax.numpy as jnp
from jax.experimental import pallas as pl
from jax.experimental.pallas import tpu as pltpu


def _attn_linear_kernel(x_ref, w_ref, b_ref, o_ref):
    """One row tile: o = x @ w + b (f32 accumulation on the MXU)."""
    acc = jnp.dot(x_ref[...], w_ref[...], preferred_element_type=jnp.float32)
    o_ref[...] = (acc + b_ref[...]).astype(o_ref.dtype)


def init_attn_linear(key, in_channels, out_channels):
    """Matches AttnLinear init: weight ~ N(0, in^-0.5), bias ~ PyTorch Linear
    default U(-1/sqrt(in), 1/sqrt(in)). Weight stored transposed, (in, out),
    so the kernel computes x @ W (identical distribution, same math)."""
    kw, kb = jax.random.split(key)
    w = jax.random.normal(kw, (in_channels, out_channels), jnp.float32) * in_channels ** -0.5
    bound = in_channels ** -0.5
    b = jax.random.uniform(kb, (1, out_channels), jnp.float32, -bound, bound)
    return w, b


def _round_up(v, m):
    return ((v + m - 1) // m) * m


@functools.partial(jax.jit, static_argnames=("tm",))
def attn_linear(x, w, b, *, tm=512):
    *lead, d_in = x.shape
    d_out = w.shape[1]

    rows = x.reshape(-1, d_in)          # metadata-only reshape (last dim unchanged)
    n = rows.shape[0]

    # Lane-dense output: pad the tiny weight/bias to a 128-multiple of output
    # columns so stores are full-lane vst instead of masked 3..N-wide partials.
    d_out_p = _round_up(d_out, 128)
    if d_out_p != d_out:
        w = jnp.pad(w, ((0, 0), (0, d_out_p - d_out)))
        b = jnp.pad(b, ((0, 0), (0, d_out_p - d_out)))

    # Row tile: large (amortize per-step overhead), multiple of 8 sublanes, but
    # never larger than the rounded-up row count. The input is NOT padded.
    tm_eff = min(tm, _round_up(n, 8))
    grid = pl.cdiv(n, tm_eff)

    out = pl.pallas_call(
        _attn_linear_kernel,
        out_shape=jax.ShapeDtypeStruct((n, d_out_p), x.dtype),
        grid_spec=pltpu.PrefetchScalarGridSpec(
            num_scalar_prefetch=0,
            grid=(grid,),
            in_specs=[
                pl.BlockSpec((tm_eff, d_in), lambda i: (i, 0)),     # row tile
                pl.BlockSpec((d_in, d_out_p), lambda i: (0, 0)),    # full weight
                pl.BlockSpec((1, d_out_p), lambda i: (0, 0)),       # bias row
            ],
            out_specs=pl.BlockSpec((tm_eff, d_out_p), lambda i: (i, 0)),
        ),
        compiler_params=pltpu.CompilerParams(
            dimension_semantics=("parallel",)),
        cost_estimate=pl.CostEstimate(
            flops=2 * n * d_in * d_out_p,
            transcendentals=0,
            bytes_accessed=4 * (n * d_in + d_in * d_out_p + n * d_out_p)),
    )(rows, w, b)

    if d_out_p != d_out:
        out = out[:, :d_out]
    return out.reshape(*lead, d_out)


def _reference(x, w, b):
    """Pure-JAX reference of the PyTorch forward for validation."""
    return x @ w + b


if __name__ == "__main__":
    key = jax.random.PRNGKey(0)
    kx, kp, k2x, k2p = jax.random.split(key, 4)

    # Main config: (batch=2, seq=1024, in=32) -> out=128.
    # 2048 rows / TM=512 -> 4 parallel grid steps (keeps both v7x TCs busy),
    # output already lane-dense (128 columns), no padding anywhere.
    x = jax.random.normal(kx, (2, 1024, 32), jnp.float32)
    w, b = init_attn_linear(kp, 32, 128)

    y = attn_linear(x, w, b)
    jax.block_until_ready(y)
    assert y.shape == (2, 1024, 128)
    assert jnp.allclose(y, _reference(x, w, b), atol=2e-4, rtol=2e-4)

    # Secondary config: out_channels=48 (exercises the lane-dense weight pad +
    # column slice) and N=1040 rows with TM=512 (exercises the ragged last tile,
    # i.e. the no-input-pad path).
    x2 = jax.random.normal(k2x, (2, 520, 32), jnp.float32)
    w2, b2 = init_attn_linear(k2p, 32, 48)
    y2 = attn_linear(x2, w2, b2)
    jax.block_until_ready(y2)
    assert y2.shape == (2, 520, 48)
    assert jnp.allclose(y2, _reference(x2, w2, b2), atol=2e-4, rtol=2e-4)

    print("KERNEL_OK")
</pallas_src>

<mosaic_0001>
module attributes {stable_mosaic.version = 11 : i64} {
  func.func @_attn_linear_kernel(%arg0: i32, %arg1: memref<512x32xf32, #tpu.memory_space<vmem>>, %arg2: memref<32x128xf32, #tpu.memory_space<vmem>>, %arg3: memref<1x128xf32, #tpu.memory_space<vmem>>, %arg4: memref<512x128xf32, #tpu.memory_space<vmem>>) attributes {dimension_semantics = [#tpu.dimension_semantics<parallel>], iteration_bounds = array<i64: 4>, scalar_prefetch = 0 : i64, scratch_operands = 0 : i64, tpu.core_type = #tpu.core_type<tc>, window_params = [{transform_indices = @transform_0, window_bounds = array<i64: 512, 32>}, {pipeline_mode = #tpu.pipeline_mode<synchronous>, transform_indices = @transform_1, window_bounds = array<i64: 32, 128>}, {pipeline_mode = #tpu.pipeline_mode<synchronous>, transform_indices = @transform_2, window_bounds = array<i64: 1, 128>}, {transform_indices = @transform_3, window_bounds = array<i64: 512, 128>}]} {
    %c0 = arith.constant 0 : index
    %c0_0 = arith.constant 0 : index
    %0 = vector.load %arg1[%c0, %c0_0] : memref<512x32xf32, #tpu.memory_space<vmem>>, vector<512x32xf32>
    %c0_1 = arith.constant 0 : index
    %c0_2 = arith.constant 0 : index
    %1 = vector.load %arg2[%c0_1, %c0_2] : memref<32x128xf32, #tpu.memory_space<vmem>>, vector<32x128xf32>
    %cst = arith.constant dense<0.000000e+00> : vector<512x128xf32>
    %2 = tpu.matmul %0, %1, %cst {dimension_numbers = #tpu.dot_dimension_numbers<[1], [0], [0], [1], [0, 0, 1, 1], [], []>} : vector<512x32xf32>, vector<32x128xf32>, vector<512x128xf32> -> vector<512x128xf32>
    %c0_3 = arith.constant 0 : index
    %c0_4 = arith.constant 0 : index
    %3 = vector.load %arg3[%c0_3, %c0_4] : memref<1x128xf32, #tpu.memory_space<vmem>>, vector<1x128xf32>
    %4 = vector.broadcast %3 : vector<1x128xf32> to vector<512x128xf32>
    %5 = arith.addf %2, %4 : vector<512x128xf32>
    %c0_5 = arith.constant 0 : index
    %c0_6 = arith.constant 0 : index
    %6 = vector.load %arg4[%c0_5, %c0_6] : memref<512x128xf32, #tpu.memory_space<vmem>>, vector<512x128xf32>
    tpu.vector_store %arg4[%c0_5, %c0_6], %5 {strides = array<i32>} : memref<512x128xf32, #tpu.memory_space<vmem>>, vector<512x128xf32>,
    return
  }
  func.func @transform_0(%arg0: i32) -> (i32, i32) {
    %c0_i32 = arith.constant 0 : i32
    %c0_i32_0 = arith.constant 0 : i32
    return %arg0, %c0_i32 : i32, i32
  }
  func.func @transform_1(%arg0: i32) -> (i32, i32) {
    %c0_i32 = arith.constant 0 : i32
    %c0_i32_0 = arith.constant 0 : i32
    %c0_i32_1 = arith.constant 0 : i32
    return %c0_i32, %c0_i32_0 : i32, i32
  }
  func.func @transform_2(%arg0: i32) -> (i32, i32) {
    %c0_i32 = arith.constant 0 : i32
    %c0_i32_0 = arith.constant 0 : i32
    %c0_i32_1 = arith.constant 0 : i32
    return %c0_i32, %c0_i32_0 : i32, i32
  }
  func.func @transform_3(%arg0: i32) -> (i32, i32) {
    %c0_i32 = arith.constant 0 : i32
    %c0_i32_0 = arith.constant 0 : i32
    return %arg0, %c0_i32 : i32, i32
  }
}

</mosaic_0001>

<bundles_post_ra>
// kernel: attn_linear.1
= control target key start
LH: loop header
LB: loop body
LE: loop exit
PB: predicated region body
PF: predicated region fallthrough
CT: control target
= control target key end

     0   :  { %8 = vsyncpa [#allocation3], 0  ;;  %s1732_s0 = inlined_call_operand.vmem [shape: f32[2048,32], index: 0, kind: input, shape index: {}]   ;;  %s1733_s1 = inlined_call_operand.vmem [shape: f32[32,128], index: 1, kind: input, shape index: {}]   ;;  %s1734_s2 = inlined_call_operand.vmem [shape: f32[1,128], index: 2, kind: input, shape index: {}]   ;;  %s1735_s3 = inlined_call_operand.hbm [shape: f32[2048,128], index: 3, kind: output, shape index: {}]  }
   0x1   :  { %10 = vsyncpa [#allocation3 + $0x1], 0  ;;  %s1349_s12 = smov 0   ;;  %s1351_s13 = smov 0  }
   0x2   :  { %s1353_s14 = smov 0   ;;  %s1355_s15 = smov 0  }
   0x3 LB: > { %s1370_s16 = sadd.s32 4294967295, %s1324_s15   ;;  %s965_s17 = sadd.s32 4294967294, %s1324_s15   ;;  %s1324_s15 = sphi %s1355_s15, %s1741_s15   ;;  %s1320_s14 = sphi %s1353_s14, %s1740_s14   ;;  %s1316_s13 = sphi %s1351_s13, %s1739_s13   ;;  %s1312_s12 = sphi %s1349_s12, %s1738_s12  }
   0x4   : > { %s1374_s18 = sadd.s32 1, %s1324_s15   ;;  %s91_s19 = sadd.s32 1, %s1320_s14 }
   0x5   : > { %s88_s20 = ssub.s32 %s1324_s15, %s1374_s18  ;;  %p101_p0 = scmp.ne.s32.totalorder %s1320_s14, %s1316_s13 }
   0x6   : > { %p89_p1 = scmp.eq.s32.totalorder %s88_s20, 0  ;;  %p102_p2 = scmp.eq.s32.totalorder %s1370_s16, 3 }
   0x7   : > { %p107_p3 = scmp.ne.s32.totalorder %s1316_s13, %s1312_s12  ;;  %p108_p4 = scmp.eq.s32.totalorder %s965_s17, 3 }
   0x8   : > { %s1385_s21 = scalar_select %p89_p1, %s1320_s14, %s91_s19  }
   0x9   : > { %p1387_p5 = por %p102_p2, %p101_p0  ;;  %p1391_p6 = por %p108_p4, %p107_p3 }
   0xa   : > { %p968_p7 = scmp.ge.s32.totalorder %s1324_s15, 1  ;;  %p141_p8 = scmp.lt.s32.totalorder %s1324_s15, 5 }
   0xc   : > { %p142_p9 = pnand %p968_p7, %p141_p8 }
   0xd   : > { %s970_s28 = sshll.u32 (!%p142_p9), %s1370_s16, 6  ;;  %s162_s10 = sand.u32 (!%p142_p9), 1, %s1316_s13  }
   0xe   : > { %145 = sbr.rel (%p142_p9) target bundleno = 300 (0x12c), region = 32  ;;  %p166_p10 = scmp.lt.s32.totalorder (!%p142_p9), %s970_s28, 255 }
   0xf   : > { %s969_s11 = sshll.u32 (!%p142_p9), %s162_s10, 9  ;;  %s1042_s24 = sshll.u32 (!%p142_p9), %s1370_s16, 13 }
  0x10   : > { %s1553_s20 = scalar_lea.vmem (!%p142_p9), [#allocation2], %s969_s11  ;;  %s1692_s16 = scalar_lea.sflag (!%p142_p9), [#allocation3], %s162_s10 }
  0x11   : > { %s903_s25 = sshll.u32 (!%p142_p9), %s1553_s20, 4  ;;  %s1326_s30 = smov (!%p142_p9), [#allocation2]   ;;  %s1682_s25 = int_to_ptr.vmem [resolvable:$true] %s903_s25 }
  0x12   : > { %s1264_s29 = scalar_lea.vmem (!%p142_p9), %s1682_s25, 8192  ;;  %s1268_s4 = sshll.u32 (!%p142_p9), %s1326_s30, 4  ;;  %s1269_s4 = int_to_ptr.vmem [resolvable:$false] %s1268_s4 }
  0x13   : > { %v239_v0 = vld [vmem:[%s1733_s1 + $0x18] sm:$0xff]  ;;  %v238_v1 = vld [vmem:[%s1733_s1 + $0x10] sm:$0xff]  ;;  %v237_v2 = vld [vmem:[%s1733_s1 + $0x8] sm:$0xff]  ;;  %s1743_s28 = smov (!%p166_p10, %s970_s28), 255  ;;  %vm247_vm0 = vcmask 261120   ;;  %p1265_p11 = scmp.ne.s32.totalorder %s1682_s25, %s1264_s29 }
  0x14   : > { %1111 = vmatprep.subr.mxu0 %v239_v0  ;;  %1215 = vmatprep.subr.mxu1 %v239_v0  ;;  %v236_v3 = vld [vmem:[%s1733_s1] sm:$0xff]  ;;  %s971_s6 = sshll.u32 %s1743_s28, 3  ;;  %s1680_s28 = scalar_lea.hbm %s1735_s3, %s1042_s24 }
  0x15   : > { %1112 = vmatpush3.msra.mxu0 %v239_v0  ;;  %1219 = vmatpush3.msra.mxu1 %v239_v0  ;;  %s1413_s9 = scalar_lea.vmem %s1732_s0, %s971_s6  ;;  %p1266_p12 = pnand %p1265_p11, %p1387_p5 }
  0x16   : > { %1113 = vmatprep.subr.mxu0 %v238_v1  ;;  %1216 = vmatprep.subr.mxu1 %v238_v1  ;;  %v172_v4 = vld [vmem:[%s1413_s9] sm:$0xff]  ;;  %v173_v6 = vld [vmem:[%s1413_s9 + $0x8] sm:$0xff]  ;;  %v174_v8 = vld [vmem:[%s1413_s9 + $0x10] sm:$0xff]  ;;  %s1270_s5 = scalar_lea.vmem %s1269_s4, 16384  ;;  %p1271_p0 = scmp.lt.s32.totalorder %s1682_s25, %s1269_s4 }
  0x17   : > { %1114 = vmatpush3.msra.mxu0 %v238_v1  ;;  %1220 = vmatpush3.msra.mxu1 %v238_v1  ;;  %v204_v5 = vld [vmem:[%s1413_s9 + $0x100] sm:$0xff]  ;;  %v205_v7 = vld [vmem:[%s1413_s9 + $0x108] sm:$0xff]  ;;  %v206_v9 = vld [vmem:[%s1413_s9 + $0x110] sm:$0xff]  ;;  %p1267_p13 = pneg %p1266_p12  ;;  %p1272_p1 = scmp.lt.s32.totalorder %s1270_s5, %s1264_s29 }
  0x18   : > { %1115 = vmatprep.subr.mxu0 %v237_v2  ;;  %1217 = vmatprep.subr.mxu1 %v237_v2  ;;  %v175_v10 = vld [vmem:[%s1413_s9 + $0x18] sm:$0xff]  ;;  %v176_v12 = vld [vmem:[%s1413_s9 + $0x20] sm:$0xff]  ;;  %v177_v14 = vld [vmem:[%s1413_s9 + $0x28] sm:$0xff] }
  0x19   : > { %1116 = vmatpush3.msra.mxu0 %v237_v2  ;;  %1221 = vmatpush3.msra.mxu1 %v237_v2  ;;  %v207_v11 = vld [vmem:[%s1413_s9 + $0x118] sm:$0xff]  ;;  %v208_v13 = vld [vmem:[%s1413_s9 + $0x120] sm:$0xff]  ;;  %v209_v15 = vld [vmem:[%s1413_s9 + $0x128] sm:$0xff]  ;;  %p1273_p2 = por %p1272_p1, %p1271_p0 }
  0x1a   : > { %1117 = vmatprep.subr.mxu0 %v236_v3  ;;  %1218 = vmatprep.subr.mxu1 %v236_v3  ;;  %v178_v16 = vld [vmem:[%s1413_s9 + $0x30] sm:$0xff]  ;;  %v179_v18 = vld [vmem:[%s1413_s9 + $0x38] sm:$0xff]  ;;  %v180_v20 = vld [vmem:[%s1413_s9 + $0x40] sm:$0xff] }
  0x1b   : > { %1118 = vmatpush3.msra.mxu0 %v236_v3  ;;  %1222 = vmatpush3.msra.mxu1 %v236_v3  ;;  %v210_v17 = vld [vmem:[%s1413_s9 + $0x130] sm:$0xff]  ;;  %v211_v19 = vld [vmem:[%s1413_s9 + $0x138] sm:$0xff]  ;;  %v212_v21 = vld [vmem:[%s1413_s9 + $0x140] sm:$0xff]  ;;  %p1274_p3 = pnand %p1273_p2, %p1267_p13 }
  0x1c   : > { %1119 = vmatprep.mubr.msk.f32.mxu0 %vm247_vm0, %v172_v4  ;;  %1167 = vmatprep.mubr.msk.f32.mxu1 %vm247_vm0, %v204_v5  ;;  %v181_v22 = vld [vmem:[%s1413_s9 + $0x48] sm:$0xff]  ;;  %v182_v24 = vld [vmem:[%s1413_s9 + $0x50] sm:$0xff]  ;;  %v183_v26 = vld [vmem:[%s1413_s9 + $0x58] sm:$0xff] }
  0x1d   : > { %1120 = vmatmul.mubr.msk.f32.vlgmr.msra.gmra.mxu0 %vm247_vm0, %v173_v6  ;;  %1168 = vmatmul.mubr.msk.f32.vlgmr.msra.gmra.mxu1 %vm247_vm0, %v205_v7  ;;  %v213_v23 = vld [vmem:[%s1413_s9 + $0x148] sm:$0xff]  ;;  %v214_v25 = vld [vmem:[%s1413_s9 + $0x150] sm:$0xff]  ;;  %v215_v27 = vld [vmem:[%s1413_s9 + $0x158] sm:$0xff] }
  0x1e   : > { %1122 = vmatprep.mubr.msk.f32.mxu0 %vm247_vm0, %v174_v8  ;;  %1170 = vmatprep.mubr.msk.f32.mxu1 %vm247_vm0, %v206_v9  ;;  %v184_v28 = vld [vmem:[%s1413_s9 + $0x60] sm:$0xff]  ;;  %v185_v30 = vld [vmem:[%s1413_s9 + $0x68] sm:$0xff]  ;;  %v186_v32 = vld [vmem:[%s1413_s9 + $0x70] sm:$0xff] }
  0x1f   : > { %v216_v29 = vld [vmem:[%s1413_s9 + $0x160] sm:$0xff]  ;;  %v217_v31 = vld [vmem:[%s1413_s9 + $0x168] sm:$0xff]  ;;  %v218_v33 = vld [vmem:[%s1413_s9 + $0x170] sm:$0xff] }
  0x20   : > { %v187_v34 = vld [vmem:[%s1413_s9 + $0x78] sm:$0xff]  ;;  %v188_v36 = vld [vmem:[%s1413_s9 + $0x80] sm:$0xff]  ;;  %v189_v38 = vld [vmem:[%s1413_s9 + $0x88] sm:$0xff] }
  0x21   : > { %1123 = vmatmul.mubr.msk.f32.gmra.mxu0 %vm247_vm0, %v175_v10  ;;  %1171 = vmatmul.mubr.msk.f32.gmra.mxu1 %vm247_vm0, %v207_v11  ;;  %v219_v35 = vld [vmem:[%s1413_s9 + $0x178] sm:$0xff]  ;;  %v220_v37 = vld [vmem:[%s1413_s9 + $0x180] sm:$0xff]  ;;  %v221_v39 = vld [vmem:[%s1413_s9 + $0x188] sm:$0xff] }
  0x22   : > { %1125 = vmatprep.mubr.msk.f32.mxu0 %vm247_vm0, %v176_v12  ;;  %1173 = vmatprep.mubr.msk.f32.mxu1 %vm247_vm0, %v208_v13  ;;  %v190_v40 = vld [vmem:[%s1413_s9 + $0x90] sm:$0xff]  ;;  %v191_v42 = vld [vmem:[%s1413_s9 + $0x98] sm:$0xff]  ;;  %v192_v44 = vld [vmem:[%s1413_s9 + $0xa0] sm:$0xff] }
  0x23   : > { %v222_v41 = vld [vmem:[%s1413_s9 + $0x190] sm:$0xff]  ;;  %v223_v43 = vld [vmem:[%s1413_s9 + $0x198] sm:$0xff]  ;;  %v224_v45 = vld [vmem:[%s1413_s9 + $0x1a0] sm:$0xff] }
  0x24   : > { %v193_v46 = vld [vmem:[%s1413_s9 + $0xa8] sm:$0xff]  ;;  %v194_v48 = vld [vmem:[%s1413_s9 + $0xb0] sm:$0xff]  ;;  %v195_v50 = vld [vmem:[%s1413_s9 + $0xb8] sm:$0xff] }
  0x25   : > { %1126 = vmatmul.mubr.msk.f32.gmra.mxu0 %vm247_vm0, %v177_v14  ;;  %1174 = vmatmul.mubr.msk.f32.gmra.mxu1 %vm247_vm0, %v209_v15  ;;  %v225_v47 = vld [vmem:[%s1413_s9 + $0x1a8] sm:$0xff]  ;;  %v226_v49 = vld [vmem:[%s1413_s9 + $0x1b0] sm:$0xff]  ;;  %v227_v51 = vld [vmem:[%s1413_s9 + $0x1b8] sm:$0xff] }
  0x26   : > { %1128 = vmatprep.mubr.msk.f32.mxu0 %vm247_vm0, %v178_v16  ;;  %1176 = vmatprep.mubr.msk.f32.mxu1 %vm247_vm0, %v210_v17  ;;  %v196_v52 = vld [vmem:[%s1413_s9 + $0xc0] sm:$0xff]  ;;  %v197_v54 = vld [vmem:[%s1413_s9 + $0xc8] sm:$0xff]  ;;  %v198_v56 = vld [vmem:[%s1413_s9 + $0xd0] sm:$0xff] }
  0x27   : > { %v228_v53 = vld [vmem:[%s1413_s9 + $0x1c0] sm:$0xff]  ;;  %v229_v55 = vld [vmem:[%s1413_s9 + $0x1c8] sm:$0xff]  ;;  %v230_v57 = vld [vmem:[%s1413_s9 + $0x1d0] sm:$0xff] }
  0x28   : > { %v199_v58 = vld [vmem:[%s1413_s9 + $0xd8] sm:$0xff]  ;;  %v200_v60 = vld [vmem:[%s1413_s9 + $0xe0] sm:$0xff]  ;;  %v201_v62 = vld [vmem:[%s1413_s9 + $0xe8] sm:$0xff] }
  0x29   : > { %1129 = vmatmul.mubr.msk.f32.gmra.mxu0 %vm247_vm0, %v179_v18  ;;  %1177 = vmatmul.mubr.msk.f32.gmra.mxu1 %vm247_vm0, %v211_v19  ;;  %v231_v59 = vld [vmem:[%s1413_s9 + $0x1d8] sm:$0xff]  ;;  %v232_v61 = vld [vmem:[%s1413_s9 + $0x1e0] sm:$0xff]  ;;  %v233_v63 = vld [vmem:[%s1413_s9 + $0x1e8] sm:$0xff] }
  0x2a   : > { %1131 = vmatprep.mubr.msk.f32.mxu0 %vm247_vm0, %v180_v20  ;;  %1179 = vmatprep.mubr.msk.f32.mxu1 %vm247_vm0, %v212_v21  ;;  %v202_v0 = vld [vmem:[%s1413_s9 + $0xf0] sm:$0xff]  ;;  %v203_v2 = vld [vmem:[%s1413_s9 + $0xf8] sm:$0xff]  ;;  %v1549_v4 = vld [vmem:[%s1734_s2] ss:$0 sm:$0xff] }
  0x2b   : > { %v234_v1 = vld [vmem:[%s1413_s9 + $0x1f0] sm:$0xff]  ;;  %v235_v3 = vld [vmem:[%s1413_s9 + $0x1f8] sm:$0xff] }
  0x2d   : > { %1132 = vmatmul.mubr.msk.f32.gmra.mxu0 %vm247_vm0, %v181_v22  ;;  %1180 = vmatmul.mubr.msk.f32.gmra.mxu1 %vm247_vm0, %v213_v23 }
  0x2e   : > { %1134 = vmatprep.mubr.msk.f32.mxu0 %vm247_vm0, %v182_v24  ;;  %1182 = vmatprep.mubr.msk.f32.mxu1 %vm247_vm0, %v214_v25 }
  0x31   : > { %1135 = vmatmul.mubr.msk.f32.gmra.mxu0 %vm247_vm0, %v183_v26  ;;  %1183 = vmatmul.mubr.msk.f32.gmra.mxu1 %vm247_vm0, %v215_v27 }
  0x32   : > { %1137 = vmatprep.mubr.msk.f32.mxu0 %vm247_vm0, %v184_v28  ;;  %1185 = vmatprep.mubr.msk.f32.mxu1 %vm247_vm0, %v216_v29 }
  0x35   : > { %1138 = vmatmul.mubr.msk.f32.gmra.mxu0 %vm247_vm0, %v185_v30  ;;  %1186 = vmatmul.mubr.msk.f32.gmra.mxu1 %vm247_vm0, %v217_v31 }
  0x36   : > { %1140 = vmatprep.mubr.msk.f32.mxu0 %vm247_vm0, %v186_v32  ;;  %1188 = vmatprep.mubr.msk.f32.mxu1 %vm247_vm0, %v218_v33 }
  0x39   : > { %1141 = vmatmul.mubr.msk.f32.gmra.mxu0 %vm247_vm0, %v187_v34  ;;  %1189 = vmatmul.mubr.msk.f32.gmra.mxu1 %vm247_vm0, %v219_v35 }
  0x3a   : > { %1143 = vmatprep.mubr.msk.f32.mxu0 %vm247_vm0, %v188_v36  ;;  %1191 = vmatprep.mubr.msk.f32.mxu1 %vm247_vm0, %v220_v37 }
  0x3d   : > { %1144 = vmatmul.mubr.msk.f32.gmra.mxu0 %vm247_vm0, %v189_v38  ;;  %1192 = vmatmul.mubr.msk.f32.gmra.mxu1 %vm247_vm0, %v221_v39 }
  0x3e   : > { %1146 = vmatprep.mubr.msk.f32.mxu0 %vm247_vm0, %v190_v40  ;;  %1194 = vmatprep.mubr.msk.f32.mxu1 %vm247_vm0, %v222_v41 }
  0x41   : > { %1147 = vmatmul.mubr.msk.f32.gmra.mxu0 %vm247_vm0, %v191_v42  ;;  %1195 = vmatmul.mubr.msk.f32.gmra.mxu1 %vm247_vm0, %v223_v43 }
  0x42   : > { %1149 = vmatprep.mubr.msk.f32.mxu0 %vm247_vm0, %v192_v44  ;;  %1197 = vmatprep.mubr.msk.f32.mxu1 %vm247_vm0, %v224_v45 }
  0x45   : > { %1150 = vmatmul.mubr.msk.f32.gmra.mxu0 %vm247_vm0, %v193_v46  ;;  %1198 = vmatmul.mubr.msk.f32.gmra.mxu1 %vm247_vm0, %v225_v47 }
  0x46   : > { %1152 = vmatprep.mubr.msk.f32.mxu0 %vm247_vm0, %v194_v48  ;;  %1200 = vmatprep.mubr.msk.f32.mxu1 %vm247_vm0, %v226_v49 }
  0x49   : > { %1153 = vmatmul.mubr.msk.f32.gmra.mxu0 %vm247_vm0, %v195_v50  ;;  %1201 = vmatmul.mubr.msk.f32.gmra.mxu1 %vm247_vm0, %v227_v51 }
  0x4a   : > { %1155 = vmatprep.mubr.msk.f32.mxu0 %vm247_vm0, %v196_v52  ;;  %1203 = vmatprep.mubr.msk.f32.mxu1 %vm247_vm0, %v228_v53 }
  0x4d   : > { %1156 = vmatmul.mubr.msk.f32.gmra.mxu0 %vm247_vm0, %v197_v54  ;;  %1204 = vmatmul.mubr.msk.f32.gmra.mxu1 %vm247_vm0, %v229_v55 }
  0x4e   : > { %1158 = vmatprep.mubr.msk.f32.mxu0 %vm247_vm0, %v198_v56  ;;  %1206 = vmatprep.mubr.msk.f32.mxu1 %vm247_vm0, %v230_v57 }
  0x51   : > { %1159 = vmatmul.mubr.msk.f32.gmra.mxu0 %vm247_vm0, %v199_v58  ;;  %1207 = vmatmul.mubr.msk.f32.gmra.mxu1 %vm247_vm0, %v231_v59 }
  0x52   : > { %1161 = vmatprep.mubr.msk.f32.mxu0 %vm247_vm0, %v200_v60  ;;  %1209 = vmatprep.mubr.msk.f32.mxu1 %vm247_vm0, %v232_v61 }
  0x55   : > { %1162 = vmatmul.mubr.msk.f32.gmra.mxu0 %vm247_vm0, %v201_v62  ;;  %1210 = vmatmul.mubr.msk.f32.gmra.mxu1 %vm247_vm0, %v233_v63 }
  0x56   : > { %1164 = vmatprep.mubr.msk.f32.mxu0 %vm247_vm0, %v202_v0  ;;  %1212 = vmatprep.mubr.msk.f32.mxu1 %vm247_vm0, %v234_v1 }
  0x59   : > { %1165 = vmatmul.mubr.msk.f32.gmra.mxu0 %vm247_vm0, %v203_v2  ;;  %1213 = vmatmul.mubr.msk.f32.gmra.mxu1 %vm247_vm0, %v235_v3 }
  0xdd   : > { %v1121_v5 = vpop.f32.mrf.mxu0  ;;  %v1169_v6 = vpop.f32.mrf.mxu1 }
  0xde   : > { %v512_v7 = vadd.f32 %v1121_v5, %v1549_v4  ;;  %v672_v8 = vadd.f32 %v1169_v6, %v1549_v4 }
  0xdf   : > { %v506_v9 = vpop.f32.mrf.mxu0  ;;  %v666_v10 = vpop.f32.mrf.mxu1 }
  0xe0   : > { %826 = vst [vmem:[%s1553_s20 + $0x8] sm:$0xff] %v512_v7  ;;  %858 = vst [vmem:[%s1553_s20 + $0x108] sm:$0xff] %v672_v8  ;;  %v507_v11 = vadd.f32 %v1549_v4, %v506_v9  ;;  %v667_v12 = vadd.f32 %v1549_v4, %v666_v10 }
  0xe1   : > { %v1124_v13 = vpop.f32.mrf.mxu0  ;;  %v1172_v14 = vpop.f32.mrf.mxu1 }
  0xe2   : > { %825 = vst [vmem:[%s1553_s20] sm:$0xff] %v507_v11  ;;  %857 = vst [vmem:[%s1553_s20 + $0x100] sm:$0xff] %v667_v12  ;;  %v522_v15 = vadd.f32 %v1124_v13, %v1549_v4  ;;  %v682_v16 = vadd.f32 %v1172_v14, %v1549_v4 }
  0xe3   : > { %v516_v17 = vpop.f32.mrf.mxu0  ;;  %v676_v18 = vpop.f32.mrf.mxu1 }
  0xe4   : > { %828 = vst [vmem:[%s1553_s20 + $0x18] sm:$0xff] %v522_v15  ;;  %860 = vst [vmem:[%s1553_s20 + $0x118] sm:$0xff] %v682_v16  ;;  %v517_v19 = vadd.f32 %v1549_v4, %v516_v17  ;;  %v677_v20 = vadd.f32 %v1549_v4, %v676_v18 }
  0xe5   : > { %v1127_v21 = vpop.f32.mrf.mxu0  ;;  %v1175_v22 = vpop.f32.mrf.mxu1 }
  0xe6   : > { %827 = vst [vmem:[%s1553_s20 + $0x10] sm:$0xff] %v517_v19  ;;  %859 = vst [vmem:[%s1553_s20 + $0x110] sm:$0xff] %v677_v20  ;;  %v532_v23 = vadd.f32 %v1127_v21, %v1549_v4  ;;  %v692_v24 = vadd.f32 %v1175_v22, %v1549_v4 }
  0xe7   : > { %v526_v25 = vpop.f32.mrf.mxu0  ;;  %v686_v26 = vpop.f32.mrf.mxu1 }
  0xe8   : > { %830 = vst [vmem:[%s1553_s20 + $0x28] sm:$0xff] %v532_v23  ;;  %862 = vst [vmem:[%s1553_s20 + $0x128] sm:$0xff] %v692_v24  ;;  %v527_v27 = vadd.f32 %v1549_v4, %v526_v25  ;;  %v687_v28 = vadd.f32 %v1549_v4, %v686_v26 }
  0xe9   : > { %v1130_v29 = vpop.f32.mrf.mxu0  ;;  %v1178_v30 = vpop.f32.mrf.mxu1 }
  0xea   : > { %829 = vst [vmem:[%s1553_s20 + $0x20] sm:$0xff] %v527_v27  ;;  %861 = vst [vmem:[%s1553_s20 + $0x120] sm:$0xff] %v687_v28  ;;  %v542_v31 = vadd.f32 %v1130_v29, %v1549_v4  ;;  %v702_v32 = vadd.f32 %v1178_v30, %v1549_v4 }
  0xeb   : > { %v536_v33 = vpop.f32.mrf.mxu0  ;;  %v696_v34 = vpop.f32.mrf.mxu1 }
  0xec   : > { %832 = vst [vmem:[%s1553_s20 + $0x38] sm:$0xff] %v542_v31  ;;  %864 = vst [vmem:[%s1553_s20 + $0x138] sm:$0xff] %v702_v32  ;;  %v537_v35 = vadd.f32 %v1549_v4, %v536_v33  ;;  %v697_v36 = vadd.f32 %v1549_v4, %v696_v34 }
  0xed   : > { %v1133_v37 = vpop.f32.mrf.mxu0  ;;  %v1181_v38 = vpop.f32.mrf.mxu1 }
  0xee   : > { %831 = vst [vmem:[%s1553_s20 + $0x30] sm:$0xff] %v537_v35  ;;  %863 = vst [vmem:[%s1553_s20 + $0x130] sm:$0xff] %v697_v36  ;;  %v552_v39 = vadd.f32 %v1133_v37, %v1549_v4  ;;  %v712_v40 = vadd.f32 %v1181_v38, %v1549_v4 }
  0xef   : > { %v546_v41 = vpop.f32.mrf.mxu0  ;;  %v706_v42 = vpop.f32.mrf.mxu1 }
  0xf0   : > { %834 = vst [vmem:[%s1553_s20 + $0x48] sm:$0xff] %v552_v39  ;;  %866 = vst [vmem:[%s1553_s20 + $0x148] sm:$0xff] %v712_v40  ;;  %v547_v43 = vadd.f32 %v1549_v4, %v546_v41  ;;  %v707_v44 = vadd.f32 %v1549_v4, %v706_v42 }
  0xf1   : > { %v1136_v45 = vpop.f32.mrf.mxu0  ;;  %v1184_v46 = vpop.f32.mrf.mxu1 }
  0xf2   : > { %833 = vst [vmem:[%s1553_s20 + $0x40] sm:$0xff] %v547_v43  ;;  %865 = vst [vmem:[%s1553_s20 + $0x140] sm:$0xff] %v707_v44  ;;  %v562_v47 = vadd.f32 %v1136_v45, %v1549_v4  ;;  %v722_v48 = vadd.f32 %v1184_v46, %v1549_v4 }
  0xf3   : > { %v556_v49 = vpop.f32.mrf.mxu0  ;;  %v716_v50 = vpop.f32.mrf.mxu1 }
  0xf4   : > { %836 = vst [vmem:[%s1553_s20 + $0x58] sm:$0xff] %v562_v47  ;;  %868 = vst [vmem:[%s1553_s20 + $0x158] sm:$0xff] %v722_v48  ;;  %v557_v51 = vadd.f32 %v1549_v4, %v556_v49  ;;  %v717_v52 = vadd.f32 %v1549_v4, %v716_v50 }
  0xf5   : > { %v1139_v53 = vpop.f32.mrf.mxu0  ;;  %v1187_v54 = vpop.f32.mrf.mxu1 }
  0xf6   : > { %835 = vst [vmem:[%s1553_s20 + $0x50] sm:$0xff] %v557_v51  ;;  %867 = vst [vmem:[%s1553_s20 + $0x150] sm:$0xff] %v717_v52  ;;  %v572_v55 = vadd.f32 %v1139_v53, %v1549_v4  ;;  %v732_v56 = vadd.f32 %v1187_v54, %v1549_v4 }
  0xf7   : > { %v566_v57 = vpop.f32.mrf.mxu0  ;;  %v726_v58 = vpop.f32.mrf.mxu1 }
  0xf8   : > { %838 = vst [vmem:[%s1553_s20 + $0x68] sm:$0xff] %v572_v55  ;;  %870 = vst [vmem:[%s1553_s20 + $0x168] sm:$0xff] %v732_v56  ;;  %v567_v59 = vadd.f32 %v1549_v4, %v566_v57  ;;  %v727_v60 = vadd.f32 %v1549_v4, %v726_v58 }
  0xf9   : > { %v1142_v61 = vpop.f32.mrf.mxu0  ;;  %v1190_v62 = vpop.f32.mrf.mxu1 }
  0xfa   : > { %837 = vst [vmem:[%s1553_s20 + $0x60] sm:$0xff] %v567_v59  ;;  %869 = vst [vmem:[%s1553_s20 + $0x160] sm:$0xff] %v727_v60  ;;  %v582_v63 = vadd.f32 %v1142_v61, %v1549_v4  ;;  %v742_v0 = vadd.f32 %v1190_v62, %v1549_v4 }
  0xfb   : > { %v576_v1 = vpop.f32.mrf.mxu0  ;;  %v736_v2 = vpop.f32.mrf.mxu1 }
  0xfc   : > { %840 = vst [vmem:[%s1553_s20 + $0x78] sm:$0xff] %v582_v63  ;;  %872 = vst [vmem:[%s1553_s20 + $0x178] sm:$0xff] %v742_v0  ;;  %v577_v3 = vadd.f32 %v1549_v4, %v576_v1  ;;  %v737_v5 = vadd.f32 %v1549_v4, %v736_v2 }
  0xfd   : > { %v1145_v6 = vpop.f32.mrf.mxu0  ;;  %v1193_v7 = vpop.f32.mrf.mxu1 }
  0xfe   : > { %839 = vst [vmem:[%s1553_s20 + $0x70] sm:$0xff] %v577_v3  ;;  %871 = vst [vmem:[%s1553_s20 + $0x170] sm:$0xff] %v737_v5  ;;  %v592_v8 = vadd.f32 %v1145_v6, %v1549_v4  ;;  %v752_v9 = vadd.f32 %v1193_v7, %v1549_v4 }
  0xff   : > { %v586_v10 = vpop.f32.mrf.mxu0  ;;  %v746_v11 = vpop.f32.mrf.mxu1 }
 0x100   : > { %842 = vst [vmem:[%s1553_s20 + $0x88] sm:$0xff] %v592_v8  ;;  %874 = vst [vmem:[%s1553_s20 + $0x188] sm:$0xff] %v752_v9  ;;  %v587_v12 = vadd.f32 %v1549_v4, %v586_v10  ;;  %v747_v13 = vadd.f32 %v1549_v4, %v746_v11 }
 0x101   : > { %v1148_v14 = vpop.f32.mrf.mxu0  ;;  %v1196_v15 = vpop.f32.mrf.mxu1 }
 0x102   : > { %841 = vst [vmem:[%s1553_s20 + $0x80] sm:$0xff] %v587_v12  ;;  %873 = vst [vmem:[%s1553_s20 + $0x180] sm:$0xff] %v747_v13  ;;  %v602_v16 = vadd.f32 %v1148_v14, %v1549_v4  ;;  %v762_v17 = vadd.f32 %v1196_v15, %v1549_v4 }
 0x103   : > { %v596_v18 = vpop.f32.mrf.mxu0  ;;  %v756_v19 = vpop.f32.mrf.mxu1 }
 0x104   : > { %844 = vst [vmem:[%s1553_s20 + $0x98] sm:$0xff] %v602_v16  ;;  %876 = vst [vmem:[%s1553_s20 + $0x198] sm:$0xff] %v762_v17  ;;  %v597_v20 = vadd.f32 %v1549_v4, %v596_v18  ;;  %v757_v21 = vadd.f32 %v1549_v4, %v756_v19 }
 0x105   : > { %v1151_v22 = vpop.f32.mrf.mxu0  ;;  %v1199_v23 = vpop.f32.mrf.mxu1 }
 0x106   : > { %843 = vst [vmem:[%s1553_s20 + $0x90] sm:$0xff] %v597_v20  ;;  %875 = vst [vmem:[%s1553_s20 + $0x190] sm:$0xff] %v757_v21  ;;  %v612_v24 = vadd.f32 %v1151_v22, %v1549_v4  ;;  %v772_v25 = vadd.f32 %v1199_v23, %v1549_v4 }
 0x107   : > { %v606_v26 = vpop.f32.mrf.mxu0  ;;  %v766_v27 = vpop.f32.mrf.mxu1 }
 0x108   : > { %846 = vst [vmem:[%s1553_s20 + $0xa8] sm:$0xff] %v612_v24  ;;  %878 = vst [vmem:[%s1553_s20 + $0x1a8] sm:$0xff] %v772_v25  ;;  %v607_v28 = vadd.f32 %v1549_v4, %v606_v26  ;;  %v767_v29 = vadd.f32 %v1549_v4, %v766_v27 }
 0x109   : > { %v1154_v30 = vpop.f32.mrf.mxu0  ;;  %v1202_v31 = vpop.f32.mrf.mxu1 }
 0x10a   : > { %845 = vst [vmem:[%s1553_s20 + $0xa0] sm:$0xff] %v607_v28  ;;  %877 = vst [vmem:[%s1553_s20 + $0x1a0] sm:$0xff] %v767_v29  ;;  %v622_v32 = vadd.f32 %v1154_v30, %v1549_v4  ;;  %v782_v33 = vadd.f32 %v1202_v31, %v1549_v4 }
 0x10b   : > { %v616_v34 = vpop.f32.mrf.mxu0  ;;  %v776_v35 = vpop.f32.mrf.mxu1 }
 0x10c   : > { %848 = vst [vmem:[%s1553_s20 + $0xb8] sm:$0xff] %v622_v32  ;;  %880 = vst [vmem:[%s1553_s20 + $0x1b8] sm:$0xff] %v782_v33  ;;  %v617_v36 = vadd.f32 %v1549_v4, %v616_v34  ;;  %v777_v37 = vadd.f32 %v1549_v4, %v776_v35 }
 0x10d   : > { %v1157_v38 = vpop.f32.mrf.mxu0  ;;  %v1205_v39 = vpop.f32.mrf.mxu1 }
 0x10e   : > { %847 = vst [vmem:[%s1553_s20 + $0xb0] sm:$0xff] %v617_v36  ;;  %879 = vst [vmem:[%s1553_s20 + $0x1b0] sm:$0xff] %v777_v37  ;;  %v632_v40 = vadd.f32 %v1157_v38, %v1549_v4  ;;  %v792_v41 = vadd.f32 %v1205_v39, %v1549_v4 }
 0x10f   : > { %v626_v42 = vpop.f32.mrf.mxu0  ;;  %v786_v43 = vpop.f32.mrf.mxu1 }
 0x110   : > { %850 = vst [vmem:[%s1553_s20 + $0xc8] sm:$0xff] %v632_v40  ;;  %882 = vst [vmem:[%s1553_s20 + $0x1c8] sm:$0xff] %v792_v41  ;;  %v627_v44 = vadd.f32 %v1549_v4, %v626_v42  ;;  %v787_v45 = vadd.f32 %v1549_v4, %v786_v43 }
 0x111   : > { %v1160_v46 = vpop.f32.mrf.mxu0  ;;  %v1208_v47 = vpop.f32.mrf.mxu1 }
 0x112   : > { %849 = vst [vmem:[%s1553_s20 + $0xc0] sm:$0xff] %v627_v44  ;;  %881 = vst [vmem:[%s1553_s20 + $0x1c0] sm:$0xff] %v787_v45  ;;  %v642_v48 = vadd.f32 %v1160_v46, %v1549_v4  ;;  %v802_v49 = vadd.f32 %v1208_v47, %v1549_v4 }
 0x113   : > { %v636_v50 = vpop.f32.mrf.mxu0  ;;  %v796_v51 = vpop.f32.mrf.mxu1 }
 0x114   : > { %852 = vst [vmem:[%s1553_s20 + $0xd8] sm:$0xff] %v642_v48  ;;  %884 = vst [vmem:[%s1553_s20 + $0x1d8] sm:$0xff] %v802_v49  ;;  %v637_v52 = vadd.f32 %v1549_v4, %v636_v50  ;;  %v797_v53 = vadd.f32 %v1549_v4, %v796_v51 }
 0x115   : > { %v1163_v54 = vpop.f32.mrf.mxu0  ;;  %v1211_v55 = vpop.f32.mrf.mxu1 }
 0x116   : > { %851 = vst [vmem:[%s1553_s20 + $0xd0] sm:$0xff] %v637_v52  ;;  %883 = vst [vmem:[%s1553_s20 + $0x1d0] sm:$0xff] %v797_v53  ;;  %v652_v56 = vadd.f32 %v1163_v54, %v1549_v4  ;;  %v812_v57 = vadd.f32 %v1211_v55, %v1549_v4 }
 0x117   : > { %v646_v58 = vpop.f32.mrf.mxu0  ;;  %v806_v59 = vpop.f32.mrf.mxu1 }
 0x118   : > { %854 = vst [vmem:[%s1553_s20 + $0xe8] sm:$0xff] %v652_v56  ;;  %886 = vst [vmem:[%s1553_s20 + $0x1e8] sm:$0xff] %v812_v57  ;;  %v647_v60 = vadd.f32 %v1549_v4, %v646_v58  ;;  %v807_v61 = vadd.f32 %v1549_v4, %v806_v59 }
 0x119   : > { %v1166_v62 = vpop.f32.mrf.mxu0  ;;  %v1214_v63 = vpop.f32.mrf.mxu1 }
 0x11a   : > { %853 = vst [vmem:[%s1553_s20 + $0xe0] sm:$0xff] %v647_v60  ;;  %885 = vst [vmem:[%s1553_s20 + $0x1e0] sm:$0xff] %v807_v61  ;;  %v662_v0 = vadd.f32 %v1166_v62, %v1549_v4  ;;  %v822_v1 = vadd.f32 %v1214_v63, %v1549_v4 }
 0x11b   : > { %v656_v2 = vpop.f32.mrf.mxu0  ;;  %v816_v3 = vpop.f32.mrf.mxu1 }
 0x11c   : > { %856 = vst [vmem:[%s1553_s20 + $0xf8] sm:$0xff] %v662_v0  ;;  %888 = vst [vmem:[%s1553_s20 + $0x1f8] sm:$0xff] %v822_v1  ;;  %v657_v5 = vadd.f32 %v1549_v4, %v656_v2  ;;  %v817_v6 = vadd.f32 %v1549_v4, %v816_v3 }
 0x11e   : > { %855 = vst [vmem:[%s1553_s20 + $0xf0] sm:$0xff] %v657_v5  ;;  %887 = vst [vmem:[%s1553_s20 + $0x1f0] sm:$0xff] %v817_v6 }
 0x11f   : > { %1277 = shalt.err (!%p1274_p3)
}
 0x120   : > { %s1278_s6 = scalar_lea.hbm %s1680_s28, 8192  ;;  %s1282_s9 = scalar_lea.hbm %s1735_s3, 32768 }
 0x121   : > { %p1279_p4 = scmp.ne.s32.totalorder %s1680_s28, %s1278_s6  ;;  %p1283_p9 = scmp.lt.s32.totalorder %s1680_s28, %s1735_s3 }
 0x122   : > { %p1284_p10 = scmp.lt.s32.totalorder %s1282_s9, %s1278_s6 }
 0x123   : > { %p1280_p7 = pnand %p1279_p4, %p1387_p5 }
 0x124   : > { %p1285_p11 = por %p1284_p10, %p1283_p9 }
 0x125   : > { %p1281_p8 = pneg %p1280_p7 }
 0x127   : > { %p1286_p12 = pnand %p1285_p11, %p1281_p8 }
 0x129   : > { %1289 = shalt.err (!%p1286_p12)
}
 0x12a   : > { %s1327_s17 = smov 128   ;;  %s1328_s19 = smov 8  }
 0x12b   : > { %1223 = dma.vmem_to_hbm [thread:$0]  (%p1387_p5), %s1682_s25, 8192, %s1680_s28, %s1692_s16, %s1327_s17, %s1327_s17, %s1328_s19  }
 0x12c PF: > { %p1229_p13 = scmp.ge.s32.totalorder %s1324_s15, 2  ;;  %s918_s20 = sand.u32 1, %s1312_s12  }
 0x12d   : > { %s919_s24 = scalar_lea.sflag [#allocation3], %s918_s20 }
 0x12e   : > { %p1226_p0 = pnand %p1229_p13, %p1391_p6 }
 0x130   : > { %p1227_p1 = pneg %p1226_p0 }
 0x132   : > { %1307 = dma.done.wait (%p1227_p1), %s919_s24, 8192  }
 0x133   : > { %1309 = vsyncadd (%p1227_p1), %s919_s24, 4294959104  ;;  %p13_p2 = scmp.ge.s32.totalorder %s1374_s18, 6   ;;  %s1738_s12 = smov %s1316_s13 }
 0x134   : > { %s1739_s13 = smov %s1320_s14  ;;  %s1740_s14 = smov %s1385_s21 }
 0x135   : > { %s1741_s15 = smov %s1374_s18  ;;  %15 = sbr.rel (!%p13_p2) target bundleno = 3 (0x3), region = 67 }
 0x13a   :  { %924 = vsyncpa [#allocation3], 1 }
 0x13b   :  { %926 = vsyncpa [#allocation3 + $0x1], 1 }

</bundles_post_ra>
